<compile_context>
chip_gen: v6e
topology: v6e:2x2x1
jax: 0.10.0
libtpu: 0.0.40
codegen_flags: <defaults>
</compile_context>

<pallas_src>
import jax
import jax.numpy as jnp
from jax.experimental import pallas as pl
from jax.experimental.pallas import tpu as pltpu


def sce_loss_kernel(pred_ref, labels_ref, w_ref, out_ref):
    pred = pred_ref[...].astype(jnp.float32)      # (TN, C)
    labels = labels_ref[...].astype(jnp.float32)  # (TN, C)

    w_all = w_ref[...]                            # (3, C) float32
    w = w_all[0:1, :]                             # raw class weights  (1, C)
    w_a = w_all[1:2, :]                           # -alpha * w         (1, C)
    w_b = w_all[2:3, :]                           # -beta  * w         (1, C)

    # --- log_softmax(pred) (CE term) -----------------------------------------
    m = jnp.max(pred, axis=-1, keepdims=True)
    z = pred - m
    lse = jnp.log(jnp.sum(jnp.exp(z), axis=-1, keepdims=True))
    log_softmax = z - lse                                          # (TN, C)

    # --- softmax(pred * w) (RCE term), exact normalization --------------------
    wp = pred * w
    e = jnp.exp(wp - jnp.max(wp, axis=-1, keepdims=True))
    # One true f32 divide per ROW (cheap, exact), then a broadcast multiply:
    # avoids both the approx-reciprocal error and a per-element divide.
    inv_denom = 1.0 / jnp.sum(e, axis=-1, keepdims=True)            # (TN, 1)
    p = jnp.clip(e * inv_denom, 1e-8, 1.0)                          # (TN, C)

    log_labels = jnp.log(jnp.clip(labels, 1e-8, 1.0))               # (TN, C)

    # --- fused reduction: alpha*ce + beta*rce in a single cross-lane sum ------
    #   alpha*ce + beta*rce = sum_c [ y*log_softmax*(-alpha*w) + p*log(y')*(-beta*w) ]
    fused = labels * log_softmax * w_a + p * log_labels * w_b
    out_ref[...] = jnp.sum(fused, axis=-1, keepdims=True)           # (TN, 1)


def _round_up(x, m):
    return ((x + m - 1) // m) * m


def _cdiv(a, b):
    return (a + b - 1) // b


def _vmem_capacity_bytes():
    """Physical VMEM of the current TPU generation; conservative fallback."""
    try:
        info = pltpu.get_tpu_info()
        cap = getattr(info, "vmem_capacity_bytes", None)
        if cap:
            return int(cap)
    except Exception:
        pass
    return 64 << 20  # v7x per-TensorCore VMEM (smallest of the targets)


def _pick_tile_n(N, C, itemsize, vmem_budget):
    """Row-tile heuristic.

    * target ~4 MiB per input block (per-step overhead ~0.35 us amortizes only
      with multi-MiB blocks on this HBM-streaming-bound kernel),
    * stay inside the scoped-VMEM budget INCLUDING the f32 in-kernel temporaries,
    * for large N prefer >= 4 grid steps and an even step count (v7x shards the
      parallel axis over 2 TensorCores) -- but never by shrinking blocks < ~1 MiB,
    * never below 8 rows, never above round_up(N, 8).
    """
    row_bytes_in = C * itemsize
    # Per-row VMEM: 2 inputs x 2 (double-buffer) + ~6 f32 tile-sized temporaries
    # (f32 upcasts, log_softmax, e, p, log_labels, fused) + double-buffered out.
    vmem_row_bytes = 4 * row_bytes_in + 6 * C * 4 + 2 * 4
    cap_vmem = max(8, (vmem_budget // vmem_row_bytes) // 8 * 8)
    target = max(8, ((4 << 20) // max(1, row_bytes_in)) // 8 * 8)
    tile = min(target, cap_vmem)

    # Prefer >= 4 steps for medium/large N, but only if blocks stay >= ~1 MiB.
    min_block_rows = max(8, ((1 << 20) // max(1, row_bytes_in)) // 8 * 8)
    four_step_rows = _round_up(_cdiv(N, 4), 8)
    if four_step_rows >= min_block_rows:
        tile = min(tile, four_step_rows)

    tile = max(8, min(tile, _round_up(N, 8)))

    # Prefer an even number of grid steps (keeps v7x's two TCs balanced).
    steps = _cdiv(N, tile)
    if steps > 1 and steps % 2 == 1:
        tile_even = max(8, _round_up(_cdiv(N, steps + 1), 8))
        if _cdiv(N, tile_even) % 2 == 0:
            tile = tile_even
    return tile


def sce_loss(pred, labels_probabilities, class_weights, alpha, beta, *, tile_n=None):
    """pred, labels_probabilities: (N, C) float (f32 or bf16); class_weights: (C,).
    Returns the per-sample SCE loss, shape (N,), float32."""
    N, C = pred.shape
    itemsize = jnp.dtype(pred.dtype).itemsize

    vmem_cap = _vmem_capacity_bytes()
    # ~48 MiB on v7x (64 MiB physical), capped at ~96 MiB on v5e/v6e (128 MiB).
    vmem_budget = min((vmem_cap * 3) // 4, 96 << 20)

    if tile_n is None:
        tile_n = _pick_tile_n(N, C, itemsize, vmem_budget)
    assert tile_n % 8 == 0, "tile_n must be a multiple of 8 (f32 sublane tiling)"

    # Fold alpha/beta and the sign into per-class weight rows, computed once.
    w = class_weights.reshape(1, C).astype(jnp.float32)
    w_all = jnp.concatenate([w, -alpha * w, -beta * w], axis=0)  # (3, C)

    grid = (_cdiv(N, tile_n),)  # ragged last block: OOB rows masked, no jnp.pad

    out = pl.pallas_call(
        sce_loss_kernel,
        out_shape=jax.ShapeDtypeStruct((N, 1), jnp.float32),
        grid_spec=pltpu.PrefetchScalarGridSpec(
            num_scalar_prefetch=0,
            grid=grid,
            in_specs=[
                pl.BlockSpec((tile_n, C), lambda i: (i, 0)),
                pl.BlockSpec((tile_n, C), lambda i: (i, 0)),
                pl.BlockSpec((3, C), lambda i: (0, 0)),
            ],
            out_specs=pl.BlockSpec((tile_n, 1), lambda i: (i, 0)),
        ),
        compiler_params=pltpu.CompilerParams(
            dimension_semantics=("parallel",),
            vmem_limit_bytes=int(vmem_budget),
        ),
    )(pred, labels_probabilities, w_all)
    return out[:, 0]


def sce_loss_ref(pred, labels, w, alpha, beta):
    """Pure-JAX reference mirroring the PyTorch module."""
    pred = pred.astype(jnp.float32)
    labels = labels.astype(jnp.float32)
    w = w.astype(jnp.float32).reshape(1, -1)
    log_softmax = jax.nn.log_softmax(pred, axis=1)
    ce = -jnp.sum(w * labels * log_softmax, axis=1)
    p = jax.nn.softmax(pred * w, axis=1)
    p = jnp.clip(p, 1e-8, 1.0)
    labels_c = jnp.clip(labels, 1e-8, 1.0)
    rce = jnp.sum(-(p * jnp.log(labels_c) * w), axis=1)
    return alpha * ce + beta * rce


if __name__ == "__main__":
    key = jax.random.PRNGKey(0)
    k1, k2, k3, k4 = jax.random.split(key, 4)

    alpha, beta = 0.5, 1.0
    # Exact softmax normalization in-kernel -> tight parity with the reference.
    RTOL = ATOL = 2e-5

    # --- Small shapes consistent with the module: batch=8, 32 classes --------
    N, C = 8, 32
    class_weights = 0.5 + 0.05 * jnp.arange(C, dtype=jnp.float32)
    pred = jax.random.normal(k1, (N, C), dtype=jnp.float32)
    labels = jax.nn.softmax(jax.random.normal(k2, (N, C), dtype=jnp.float32), axis=1)

    loss = jax.block_until_ready(sce_loss(pred, labels, class_weights, alpha, beta))
    ref = sce_loss_ref(pred, labels, class_weights, alpha, beta)
    assert loss.shape == (N,)
    assert jnp.allclose(loss, ref, rtol=RTOL, atol=ATOL), (loss, ref)

    # --- Ragged, multi-step grid (N not a multiple of tile_n) -----------------
    # Exercises the no-pad boundary-masked path and the pipelined multi-block path.
    N2 = 197
    pred2 = jax.random.normal(k3, (N2, C), dtype=jnp.float32)
    labels2 = jax.nn.softmax(jax.random.normal(k4, (N2, C), dtype=jnp.float32), axis=1)
    loss2 = jax.block_until_ready(
        sce_loss(pred2, labels2, class_weights, alpha, beta, tile_n=64))
    ref2 = sce_loss_ref(pred2, labels2, class_weights, alpha, beta)
    assert loss2.shape == (N2,)
    assert jnp.allclose(loss2, ref2, rtol=RTOL, atol=ATOL), (loss2, ref2)

    # --- bf16 HBM inputs (halves streamed bytes); in-kernel math stays f32 ---
    pred_bf = pred2.astype(jnp.bfloat16)
    labels_bf = labels2.astype(jnp.bfloat16)
    loss_bf = jax.block_until_ready(sce_loss(pred_bf, labels_bf, class_weights, alpha, beta))
    ref_bf = sce_loss_ref(pred_bf, labels_bf, class_weights, alpha, beta)
    assert jnp.allclose(loss_bf, ref_bf, rtol=RTOL, atol=ATOL), (loss_bf, ref_bf)

    print("KERNEL_OK")
</pallas_src>

<mosaic_0001>
module attributes {stable_mosaic.version = 11 : i64} {
  func.func @sce_loss_kernel(%arg0: i32, %arg1: memref<8x32xf32, #tpu.memory_space<vmem>>, %arg2: memref<8x32xf32, #tpu.memory_space<vmem>>, %arg3: memref<3x32xf32, #tpu.memory_space<vmem>>, %arg4: memref<8x1xf32, #tpu.memory_space<vmem>>) attributes {dimension_semantics = [#tpu.dimension_semantics<parallel>], iteration_bounds = array<i64: 1>, scalar_prefetch = 0 : i64, scratch_operands = 0 : i64, tpu.core_type = #tpu.core_type<tc>, window_params = [{transform_indices = @transform_0, window_bounds = array<i64: 8, 32>}, {transform_indices = @transform_1, window_bounds = array<i64: 8, 32>}, {pipeline_mode = #tpu.pipeline_mode<synchronous>, transform_indices = @transform_2, window_bounds = array<i64: 3, 32>}, {transform_indices = @transform_3, window_bounds = array<i64: 8, 1>}]} {
    %c0 = arith.constant 0 : index
    %c0_0 = arith.constant 0 : index
    %0 = vector.load %arg1[%c0, %c0_0] : memref<8x32xf32, #tpu.memory_space<vmem>>, vector<8x32xf32>
    %c0_1 = arith.constant 0 : index
    %c0_2 = arith.constant 0 : index
    %1 = vector.load %arg2[%c0_1, %c0_2] : memref<8x32xf32, #tpu.memory_space<vmem>>, vector<8x32xf32>
    %c0_3 = arith.constant 0 : index
    %c0_4 = arith.constant 0 : index
    %2 = vector.load %arg3[%c0_3, %c0_4] : memref<3x32xf32, #tpu.memory_space<vmem>>, vector<3x32xf32>
    %3 = vector.extract_strided_slice %2 {offsets = [0, 0], sizes = [1, 32], strides = [1, 1]} : vector<3x32xf32> to vector<1x32xf32>
    %4 = vector.extract_strided_slice %2 {offsets = [1, 0], sizes = [1, 32], strides = [1, 1]} : vector<3x32xf32> to vector<1x32xf32>
    %5 = vector.extract_strided_slice %2 {offsets = [2, 0], sizes = [1, 32], strides = [1, 1]} : vector<3x32xf32> to vector<1x32xf32>
    %cst = arith.constant dense<0xFF800000> : vector<8xf32>
    %6 = vector.multi_reduction <maximumf>, %0, %cst [1] : vector<8x32xf32> to vector<8xf32>
    %7 = vector.shape_cast %6 : vector<8xf32> to vector<8x1xf32>
    %8 = vector.broadcast %7 : vector<8x1xf32> to vector<8x32xf32>
    %9 = arith.subf %0, %8 : vector<8x32xf32>
    %10 = math.exp %9 : vector<8x32xf32>
    %cst_5 = arith.constant dense<0.000000e+00> : vector<8xf32>
    %11 = vector.multi_reduction <add>, %10, %cst_5 [1] : vector<8x32xf32> to vector<8xf32>
    %12 = vector.shape_cast %11 : vector<8xf32> to vector<8x1xf32>
    %13 = math.log %12 : vector<8x1xf32>
    %14 = vector.broadcast %13 : vector<8x1xf32> to vector<8x32xf32>
    %15 = arith.subf %9, %14 : vector<8x32xf32>
    %16 = vector.broadcast %3 : vector<1x32xf32> to vector<8x32xf32>
    %17 = arith.mulf %0, %16 : vector<8x32xf32>
    %cst_6 = arith.constant dense<0xFF800000> : vector<8xf32>
    %18 = vector.multi_reduction <maximumf>, %17, %cst_6 [1] : vector<8x32xf32> to vector<8xf32>
    %19 = vector.shape_cast %18 : vector<8xf32> to vector<8x1xf32>
    %20 = vector.broadcast %19 : vector<8x1xf32> to vector<8x32xf32>
    %21 = arith.subf %17, %20 : vector<8x32xf32>
    %22 = math.exp %21 : vector<8x32xf32>
    %cst_7 = arith.constant dense<0.000000e+00> : vector<8xf32>
    %23 = vector.multi_reduction <add>, %22, %cst_7 [1] : vector<8x32xf32> to vector<8xf32>
    %24 = vector.shape_cast %23 : vector<8xf32> to vector<8x1xf32>
    %cst_8 = arith.constant 1.000000e+00 : f32
    %25 = vector.broadcast %cst_8 : f32 to vector<8x1xf32>
    %26 = arith.divf %25, %24 : vector<8x1xf32>
    %27 = vector.broadcast %26 : vector<8x1xf32> to vector<8x32xf32>
    %28 = arith.mulf %22, %27 : vector<8x32xf32>
    %cst_9 = arith.constant 9.99999993E-9 : f32
    %cst_10 = arith.constant 1.000000e+00 : f32
    %29 = vector.broadcast %cst_9 : f32 to vector<8x32xf32>
    %30 = arith.maximumf %29, %28 : vector<8x32xf32>
    %31 = vector.broadcast %cst_10 : f32 to vector<8x32xf32>
    %32 = arith.minimumf %31, %30 : vector<8x32xf32>
    %cst_11 = arith.constant 9.99999993E-9 : f32
    %cst_12 = arith.constant 1.000000e+00 : f32
    %33 = vector.broadcast %cst_11 : f32 to vector<8x32xf32>
    %34 = arith.maximumf %33, %1 : vector<8x32xf32>
    %35 = vector.broadcast %cst_12 : f32 to vector<8x32xf32>
    %36 = arith.minimumf %35, %34 : vector<8x32xf32>
    %37 = math.log %36 : vector<8x32xf32>
    %38 = arith.mulf %1, %15 : vector<8x32xf32>
    %39 = vector.broadcast %4 : vector<1x32xf32> to vector<8x32xf32>
    %40 = arith.mulf %38, %39 : vector<8x32xf32>
    %41 = arith.mulf %32, %37 : vector<8x32xf32>
    %42 = vector.broadcast %5 : vector<1x32xf32> to vector<8x32xf32>
    %43 = arith.mulf %41, %42 : vector<8x32xf32>
    %44 = arith.addf %40, %43 : vector<8x32xf32>
    %cst_13 = arith.constant dense<0.000000e+00> : vector<8xf32>
    %45 = vector.multi_reduction <add>, %44, %cst_13 [1] : vector<8x32xf32> to vector<8xf32>
    %46 = vector.shape_cast %45 : vector<8xf32> to vector<8x1xf32>
    %c0_14 = arith.constant 0 : index
    %c0_15 = arith.constant 0 : index
    %47 = vector.load %arg4[%c0_14, %c0_15] : memref<8x1xf32, #tpu.memory_space<vmem>>, vector<8x1xf32>
    tpu.vector_store %arg4[%c0_14, %c0_15], %46 {strides = array<i32>} : memref<8x1xf32, #tpu.memory_space<vmem>>, vector<8x1xf32>,
    return
  }
  func.func @transform_0(%arg0: i32) -> (i32, i32) {
    %c0_i32 = arith.constant 0 : i32
    %c0_i32_0 = arith.constant 0 : i32
    return %arg0, %c0_i32 : i32, i32
  }
  func.func @transform_1(%arg0: i32) -> (i32, i32) {
    %c0_i32 = arith.constant 0 : i32
    %c0_i32_0 = arith.constant 0 : i32
    return %arg0, %c0_i32 : i32, i32
  }
  func.func @transform_2(%arg0: i32) -> (i32, i32) {
    %c0_i32 = arith.constant 0 : i32
    %c0_i32_0 = arith.constant 0 : i32
    %c0_i32_1 = arith.constant 0 : i32
    return %c0_i32, %c0_i32_0 : i32, i32
  }
  func.func @transform_3(%arg0: i32) -> (i32, i32) {
    %c0_i32 = arith.constant 0 : i32
    %c0_i32_0 = arith.constant 0 : i32
    return %arg0, %c0_i32 : i32, i32
  }
}

</mosaic_0001>

<bundles_post_ra>
// kernel: tpu_custom_call.1
= control target key start
LH: loop header
LB: loop body
LE: loop exit
PB: predicated region body
PF: predicated region fallthrough
CT: control target
= control target key end

     0   :  { %8 = vsyncpa [#allocation3], 0  ;;  %s229_s0 = inlined_call_operand.hbm [shape: f32[8,32], index: 0, kind: input, shape index: {}]   ;;  %s230_s1 = inlined_call_operand.hbm [shape: f32[8,32], index: 1, kind: input, shape index: {}]   ;;  %s231_s2 = inlined_call_operand.hbm [shape: f32[3,32], index: 2, kind: input, shape index: {}]   ;;  %s232_s3 = inlined_call_operand.vmem [shape: f32[8,1], index: 3, kind: output, shape index: {}]  }
   0x1   :  { %9 = vsyncpa [#allocation5], 0  ;;  %s189_s12 = smov [#allocation4]   ;;  %s190_s14 = smov [#allocation2]  }
   0x2   :  { %s26_s13 = sshll.u32 %s189_s12, 4  ;;  %s16_s15 = sshll.u32 %s190_s14, 4  ;;  %s27_s13 = int_to_ptr.vmem [resolvable:$true] %s26_s13  ;;  %s17_s15 = int_to_ptr.vmem [resolvable:$true] %s16_s15 }
   0x3   :  { %s133_s16 = scalar_lea.vmem %s27_s13, 128  ;;  %p138_p1 = scmp.lt.s32.totalorder %s27_s13, %s27_s13 }
   0x4   :  { %p134_p0 = scmp.ne.s32.totalorder %s27_s13, %s133_s16  ;;  %p139_p2 = scmp.lt.s32.totalorder %s133_s16, %s133_s16 }
   0x6   :  { %p140_p3 = por %p139_p2, %p138_p1 }
   0x8   :  { %p141_p4 = pnand %p140_p3, %p134_p0 }
   0xa   :  { %144 = shalt.err (!%p141_p4)
}
   0xb   :  { %29 = dma.hbm_to_vmem [thread:$0]  %s230_s1, 128, %s27_s13, [#allocation5]  }
   0xc   :  { %s153_s19 = scalar_lea.vmem %s17_s15, 128  ;;  %p158_p6 = scmp.lt.s32.totalorder %s17_s15, %s17_s15 }
   0xd   :  { %p154_p5 = scmp.ne.s32.totalorder %s17_s15, %s153_s19  ;;  %p159_p7 = scmp.lt.s32.totalorder %s153_s19, %s153_s19 }
   0xf   :  { %p160_p8 = por %p159_p7, %p158_p6 }
  0x11   :  { %p161_p9 = pnand %p160_p8, %p154_p5 }
  0x13   :  { %164 = shalt.err (!%p161_p9)
}
  0x14   :  { %19 = dma.hbm_to_vmem [thread:$0]  %s229_s0, 128, %s17_s15, [#allocation3]  }
  0x15   :  { %s191_s22 = smov [#allocation6]  }
  0x16   :  { %s36_s23 = sshll.u32 %s191_s22, 4  ;;  %s37_s23 = int_to_ptr.vmem [resolvable:$true] %s36_s23 }
  0x17   :  { %s173_s24 = scalar_lea.vmem %s37_s23, 64  ;;  %p178_p11 = scmp.lt.s32.totalorder %s37_s23, %s37_s23 }
  0x18   :  { %p174_p10 = scmp.ne.s32.totalorder %s37_s23, %s173_s24  ;;  %p179_p12 = scmp.lt.s32.totalorder %s173_s24, %s173_s24 }
  0x1a   :  { %p180_p13 = por %p179_p12, %p178_p11 }
  0x1c   :  { %p181_p0 = pnand %p180_p13, %p174_p10 }
  0x1e   :  { %184 = shalt.err (!%p181_p0)
}
  0x1f   :  { %39 = dma.hbm_to_vmem [thread:$0]  %s231_s2, 64, %s37_s23, [#allocation5]  }
  0x20   :  { %185 = dma.done.wait [#allocation3], 128  }
  0x21   :  { %186 = vsyncadd [#allocation3], 4294967168 }
  0x22   :  { %187 = dma.done.wait [#allocation5], 192  }
  0x23   :  { %188 = vsyncadd [#allocation5], 4294967104  ;;  %v65_v0 = vlaneseq  ;;  %v49_v3 = vld [vmem:[#allocation2] sm:$0xff]  ;;  %v51_v4 = vld [vmem:[#allocation6] sm:$0x7]  ;;  %vm52_vm0 = vcmask 261120  }
  0x24   :  { %v53_v8 = vsel %vm52_vm0, %v49_v3, -inf  ;;  %v50_v19 = vld [vmem:[#allocation4] sm:$0xff]  ;;  %vm104_vm1 = vcmask 7168  }
  0x25   :  { %v66_v1 = vshrl.u32 %v65_v0, 7  ;;  %v84_v20 = vmax.f32 %v50_v19, 1e-08 }
  0x27   :  { %v67_v2 = vsub.s32 0, %v66_v1  ;;  %v85_v21 = vmin.f32 %v84_v20, 1.0  ;;  %v91_v29 = vsub.s32 1, %v66_v1  ;;  %v97_v30 = vsub.s32 2, %v66_v1 }
  0x29   :  { %v68_v5 = vrot.slane %v51_v4, %v67_v2  ;;  %v92_v35 = vrot.slane %v51_v4, %v91_v29  ;;  %v98_v37 = vrot.slane %v51_v4, %v97_v30 }
  0x2b   :  { %v69_v6 = vmul.f32 %v68_v5, %v49_v3 }
  0x2d   :  { %v70_v7 = vsel %vm52_vm0, %v69_v6, -inf }
  0x2e   :  { %71 = vmax.xlane.f32.xlu0 %v70_v7 }
  0x32   :  { %54 = vmax.xlane.f32.xlu0 %v53_v8 }
  0xb7   :  { %v72_v9 = vpop.xlane.xlu0 %71 }
  0xb8   :  { %v73_v10 = vsub.f32 %v69_v6, %v72_v9 }
  0xba   :  { %v74_v11 = vmul.f32 1.442695, %v73_v10 }
  0xbb   :  { %v55_v12 = vpop.xlane.xlu0 %54 }
  0xbc   :  { %115 = vpow2.f32 %v74_v11  ;;  %v56_v13 = vsub.f32 %v49_v3, %v55_v12 }
  0xbe   :  { %v57_v14 = vmul.f32 1.442695, %v56_v13 }
  0xc0   :  { %117 = vpow2.f32 %v57_v14 }
  0xc1   :  { %119 = vlog2.f32 %v85_v21 }
  0xc9   :  { %v116_v15 = vpop.eup %115 }
  0xca   :  { %v76_v16 = vsel %vm52_vm0, %v116_v15, 0.0 }
  0xcb   :  { %77 = vadd.xlane.f32.xlu1 %v76_v16 }
  0xcd   :  { %v118_v17 = vpop.eup %117 }
  0xce   :  { %v59_v18 = vsel %vm52_vm0, %v118_v17, 0.0  ;;  %v120_v24 = vpop.eup %119 }
  0xcf   :  { %60 = vadd.xlane.f32.xlu1 %v59_v18  ;;  %v87_v28 = vmul.f32 0.6931472, %v120_v24 }
 0x154   :  { %v78_v22 = vpop.xlane.xlu1 %77 }
 0x155   :  { %121 = vrcp.f32 %v78_v22 }
 0x158   :  { %v61_v23 = vpop.xlane.xlu1 %60 }
 0x159   :  { %123 = vlog2.f32 %v61_v23 }
 0x162   :  { %v122_v25 = vpop.eup %121 }
 0x163   :  { %v81_v26 = vmul.f32 %v122_v25, %v116_v15 }
 0x165   :  { %v82_v27 = vmax.f32 %v81_v26, 1e-08 }
 0x166   :  { %v124_v31 = vpop.eup %123 }
 0x167   :  { %v63_v32 = vmul.f32 0.6931472, %v124_v31  ;;  %v83_v33 = vmin.f32 %v82_v27, 1.0 }
 0x169   :  { %v64_v34 = vsub.f32 %v56_v13, %v63_v32  ;;  %v94_v36 = vmul.f32 %v87_v28, %v83_v33 }
 0x16b   :  { %v88_v38 = vmul.f32 %v64_v34, %v50_v19  ;;  %v99_v40 = vmul.f32 %v98_v37, %v94_v36 }
 0x16d   :  { %v93_v39 = vmul.f32 %v92_v35, %v88_v38 }
 0x16f   :  { %v100_v41 = vadd.f32 %v99_v40, %v93_v39 }
 0x171   :  { %v101_v42 = vsel %vm52_vm0, %v100_v41, 0.0 }
 0x172   :  { %102 = vadd.xlane.f32.xlu0 %v101_v42 }
 0x1fb   :  { %v103_v43 = vpop.xlane.xlu0 %102 }
 0x1fc   :  { %105 = vst.msk [vmem:[%s232_s3] sm:$0xff] %vm104_vm1, %v103_v43 }
 0x1fd   :  { %110 = vsyncpa [#allocation3], 1 }
 0x1fe   :  { %111 = vsyncpa [#allocation5], 1 }

</bundles_post_ra>
